<compile_context>
chip_gen: v7x
topology: tpu7x:2x2x1
jax: 0.10.0
libtpu: 0.0.40
codegen_flags: <defaults>
</compile_context>

<pallas_src>
import functools
import math

import jax
import jax.numpy as jnp
from jax import lax
from jax.experimental import pallas as pl
from jax.experimental.pallas import tpu as pltpu


# ---------------------------------------------------------------------------
# Small helpers
# ---------------------------------------------------------------------------

def _round_up(n, m):
    return ((n + m - 1) // m) * m


def _sublane(dtype):
    """Native sublane multiple for a dtype (f32: 8, bf16/f16: 16, int8: 32)."""
    return max(8, 32 // jnp.dtype(dtype).itemsize)


def _acc_dtype(dtype):
    """In-kernel compare/accumulate dtype (exact for <=32-bit ints, floats)."""
    if jnp.issubdtype(dtype, jnp.floating):
        return jnp.float32
    return jnp.int32


def _fill_value(dtype):
    """Smallest value of `dtype` (pad value for the reduced axis)."""
    if jnp.issubdtype(dtype, jnp.floating):
        return float("-inf")
    if dtype == jnp.bool_:
        return False
    return int(jnp.iinfo(dtype).min)


def _neg_init(acc_dtype):
    return float("-inf") if acc_dtype == jnp.float32 else int(jnp.iinfo(jnp.int32).min)


def _budget():
    """(single-pass block elems, tiled-fold block elems, vmem_limit_bytes).

    Element budgets are counted in f32 (the in-kernel compare dtype), so
    sub-32-bit inputs get the same VMEM footprint but fewer HBM bytes.
    v5e/v6e: 128 MiB physical VMEM -> larger blocks, 64 MiB scoped limit.
    v7x: 64 MiB per TensorCore -> smaller blocks, 40 MiB scoped limit.
    """
    try:
        cap = pltpu.get_tpu_info().vmem_capacity_bytes
    except Exception:
        cap = 64 << 20
    if cap >= (100 << 20):                      # v5e / v6e
        return (1 << 20), (2 << 20), (64 << 20)
    return (1 << 19), (1 << 20), (40 << 20)     # v7x / unknown


def _pick_row_tile(rows, max_rows, align):
    """Largest multiple of `align` dividing `rows` (itself a multiple of
    `align`), <= max_rows, and leaving >= 2 row tiles when rows is big enough
    so v7x's second TensorCore has work on the 'parallel' axis."""
    cap = min(max_rows, rows)
    if rows >= 2 * align:
        cap = min(cap, rows // 2)
    cap = max(align, (cap // align) * align)
    t = cap
    while t >= align:
        if rows % t == 0:
            return t
        t -= align
    return align


# ---------------------------------------------------------------------------
# Kernels
# ---------------------------------------------------------------------------

def _rows_single_kernel(acc_dtype, x_ref, idx_ref, max_ref):
    """Argmax along the last axis; the whole reduced axis fits one block.

    x_ref: (tR, K) native dtype.  idx_ref: (tR, 1) int32.  max_ref: (tR, 1).
    """
    x = x_ref[...].astype(acc_dtype)                        # in-VMEM upcast only
    k_size = x.shape[-1]
    row_max = jnp.max(x, axis=-1, keepdims=True)            # (tR, 1)
    lane = lax.broadcasted_iota(jnp.int32, x.shape, 1)      # (tR, K)
    # min index among maxima -> first occurrence (matches torch/jnp).
    idx = jnp.min(jnp.where(x == row_max, lane, k_size), axis=-1, keepdims=True)
    idx_ref[...] = idx.astype(jnp.int32)
    max_ref[...] = row_max.astype(max_ref.dtype)


def _rows_tiled_kernel(acc_dtype, t_k, x_ref, idx_ref, max_ref, mvec, ivec):
    """Argmax along the last axis with the reduced axis tiled over the grid.

    Per-lane running (max, index) fold: scratch is (tR, 128); every 128-lane
    chunk costs one compare + two selects, and the XLU lane collapse happens
    exactly once, on the final K step.  Strict '>' keeps the first occurrence.
    """
    k = pl.program_id(1)
    t_r = mvec.shape[0]

    @pl.when(k == 0)
    def _():
        mvec[...] = jnp.full(mvec.shape, _neg_init(acc_dtype), dtype=mvec.dtype)
        ivec[...] = jnp.zeros(ivec.shape, jnp.int32)

    lane = lax.broadcasted_iota(jnp.int32, (t_r, 128), 1)
    base = k * t_k
    for c in range(t_k // 128):                              # static unroll
        chunk = x_ref[:, c * 128:(c + 1) * 128].astype(acc_dtype)
        better = chunk > mvec[...]
        mvec[...] = jnp.where(better, chunk, mvec[...])
        ivec[...] = jnp.where(better, lane + (base + c * 128), ivec[...])

    @pl.when(k == pl.num_programs(1) - 1)
    def _():
        m = mvec[...]
        row_max = jnp.max(m, axis=-1, keepdims=True)
        idx = jnp.min(jnp.where(m == row_max, ivec[...], jnp.iinfo(jnp.int32).max),
                      axis=-1, keepdims=True)
        idx_ref[...] = idx
        max_ref[...] = row_max.astype(max_ref.dtype)


def _mid_kernel(acc_dtype, t_pre, k_size, x_ref, o_ref):
    """Argmax along the middle axis of a (pre, K, post) view — no transpose.

    x_ref: (t_pre, K, tPost) native dtype; o_ref: (t_pre, 1, tPost) int32.
    Compute is done per leading slice so all vector ops stay rank-2
    (sublane reduction over K, `post` on lanes).
    """
    for p in range(t_pre):                                   # static unroll (<= 8)
        x = x_ref[p].astype(acc_dtype)                       # (K, tPost)
        mx = jnp.max(x, axis=0, keepdims=True)               # (1, tPost)
        kio = lax.broadcasted_iota(jnp.int32, x.shape, 0)
        idx = jnp.min(jnp.where(x == mx, kio, k_size), axis=0, keepdims=True)
        o_ref[p] = idx.astype(jnp.int32)


# ---------------------------------------------------------------------------
# Drivers
# ---------------------------------------------------------------------------

def _argmax_rows(x2):
    """x2: (R, K) native dtype.  Returns (idx (R,) int32, rowmax (R,))."""
    rows, k_size = x2.shape
    acc = _acc_dtype(x2.dtype)
    single_elems, tiled_elems, vmem_limit = _budget()
    align = _sublane(x2.dtype)

    rp = _round_up(max(rows, 1), align)
    if rp != rows:
        # TODO(synk): row padding costs an extra HBM pass for unaligned R.
        x2 = jnp.pad(x2, ((0, rp - rows), (0, 0)))

    if k_size * align <= single_elems:
        # Whole reduced axis in one block: no accumulator, single pass.
        max_rows = max(align, (single_elems // max(k_size, 1)) // align * align)
        t_r = _pick_row_tile(rp, max_rows, align)
        idx, mx = pl.pallas_call(
            functools.partial(_rows_single_kernel, acc),
            out_shape=(jax.ShapeDtypeStruct((rp, 1), jnp.int32),
                       jax.ShapeDtypeStruct((rp, 1), acc)),
            grid_spec=pltpu.PrefetchScalarGridSpec(
                num_scalar_prefetch=0,
                grid=(rp // t_r,),
                in_specs=[pl.BlockSpec((t_r, k_size), lambda i: (i, 0))],
                out_specs=(pl.BlockSpec((t_r, 1), lambda i: (i, 0)),
                           pl.BlockSpec((t_r, 1), lambda i: (i, 0))),
            ),
            compiler_params=pltpu.CompilerParams(
                dimension_semantics=("parallel",),
                vmem_limit_bytes=vmem_limit),
        )(x2)
    else:
        # Reduced axis tiled over the grid (last, "arbitrary"); per-lane fold.
        t_r = _pick_row_tile(rp, 256, align)
        t_k = max(128, min(8192, (tiled_elems // t_r) // 128 * 128))
        kp = _round_up(k_size, t_k)
        if kp != k_size:
            # TODO(synk): tail padding is one extra pass; an in-kernel pl.when
            # tail mask would avoid it.
            x2 = jnp.pad(x2, ((0, 0), (0, kp - k_size)),
                         constant_values=_fill_value(x2.dtype))
        idx, mx = pl.pallas_call(
            functools.partial(_rows_tiled_kernel, acc, t_k),
            out_shape=(jax.ShapeDtypeStruct((rp, 1), jnp.int32),
                       jax.ShapeDtypeStruct((rp, 1), acc)),
            grid_spec=pltpu.PrefetchScalarGridSpec(
                num_scalar_prefetch=0,
                grid=(rp // t_r, kp // t_k),
                in_specs=[pl.BlockSpec((t_r, t_k), lambda i, j: (i, j))],
                out_specs=(pl.BlockSpec((t_r, 1), lambda i, j: (i, 0)),
                           pl.BlockSpec((t_r, 1), lambda i, j: (i, 0))),
                scratch_shapes=[pltpu.VMEM((t_r, 128), acc),
                                pltpu.VMEM((t_r, 128), jnp.int32)],
            ),
            compiler_params=pltpu.CompilerParams(
                dimension_semantics=("parallel", "arbitrary"),
                vmem_limit_bytes=vmem_limit),
        )(x2)
    return idx[:rows, 0], mx[:rows, 0]


def _argmax_mid(x3):
    """x3: (pre, K, post) native dtype; argmax over axis 1 without relayout.
    Returns a (pre, post) int32 array, or None if the caller must fall back."""
    pre, k_size, post = x3.shape
    acc = _acc_dtype(x3.dtype)
    single_elems, _, vmem_limit = _budget()

    # Lane tile over `post`: a multiple of 128 dividing post (prefer >=2 tiles
    # for v7x megacore), or the full dimension when it is small.
    t_post = None
    if post % 128 == 0:
        cap = (single_elems // max(k_size, 1)) // 128 * 128
        if post >= 256:
            cap = min(cap, (post // 2) // 128 * 128)
        cap = min(cap, post)
        t = cap
        while t >= 128:
            if post % t == 0:
                t_post = t
                break
            t -= 128
    if t_post is None and k_size * post <= single_elems:
        t_post = post
    if t_post is None or k_size * t_post > single_elems:
        return None

    t_pre = 1
    for cand in range(min(pre, 8, max(1, single_elems // (k_size * t_post))), 0, -1):
        if pre % cand == 0:
            t_pre = cand
            break

    out = pl.pallas_call(
        functools.partial(_mid_kernel, acc, t_pre, k_size),
        out_shape=jax.ShapeDtypeStruct((pre, 1, post), jnp.int32),
        grid_spec=pltpu.PrefetchScalarGridSpec(
            num_scalar_prefetch=0,
            grid=(pre // t_pre, post // t_post),
            in_specs=[pl.BlockSpec((t_pre, k_size, t_post),
                                   lambda i, j: (i, 0, j))],
            out_specs=pl.BlockSpec((t_pre, 1, t_post), lambda i, j: (i, 0, j)),
        ),
        compiler_params=pltpu.CompilerParams(
            dimension_semantics=("parallel", "parallel"),
            vmem_limit_bytes=vmem_limit),
    )(x3)
    return out.reshape(pre, post)


# ---------------------------------------------------------------------------
# Public wrapper (== torch.argmax(x, dim))
# ---------------------------------------------------------------------------

def pallas_argmax(x, dim=None):
    """Pallas equivalent of torch.argmax(x, dim=dim); indices are int32."""
    if dim is None:
        flat = x.reshape(-1)
        n = flat.shape[0]
        # Two-stage flat argmax: view as (rows, k) so the row axis is
        # megacore-parallel and all sublanes are used; tiny combine afterwards.
        k = max(128, _round_up(pl.cdiv(n, 256), 128))
        pad = (-n) % k
        if pad:
            # TODO(synk): ragged n pays one tail-pad pass.
            flat = jnp.pad(flat, (0, pad), constant_values=_fill_value(x.dtype))
        idx, mx = _argmax_rows(flat.reshape(-1, k))
        row = jnp.argmax(mx)                 # first row holding the global max
        return (row.astype(jnp.int32) * k + idx[row]).reshape(())

    dim = dim % x.ndim
    k = x.shape[dim]
    out_shape = x.shape[:dim] + x.shape[dim + 1:]

    if dim == x.ndim - 1:
        rows = math.prod(out_shape) if out_shape else 1
        idx, _ = _argmax_rows(x.reshape(rows, k))
        return idx.reshape(out_shape)

    # Non-minor dim: keep the HBM layout (no moveaxis relayout).  View as
    # (pre, K, post) and reduce along the sublane axis in-kernel.
    pre = math.prod(x.shape[:dim]) if dim else 1
    post = math.prod(x.shape[dim + 1:])
    out = _argmax_mid(x.reshape(pre, k, post))
    if out is None:
        # TODO(synk): rare fallback (huge / lane-unfriendly K, post) pays one
        # relayout pass.
        xm = jnp.moveaxis(x, dim, -1)
        idx, _ = _argmax_rows(xm.reshape(-1, k))
        return idx.reshape(out_shape)
    return out.reshape(out_shape)


if __name__ == "__main__":
    key = jax.random.PRNGKey(0)
    x = jax.random.normal(key, (2, 4, 16, 16), jnp.float32)

    # ArgMax() default: dim=None -> argmax over the flattened tensor.
    out_none = jax.block_until_ready(pallas_argmax(x, dim=None))
    ref_none = jnp.argmax(x)
    assert out_none.shape == ()
    assert int(out_none) == int(ref_none)

    # ArgMax(dim=1): channel argmax — non-minor dim, no-transpose path.
    out_c = jax.block_until_ready(pallas_argmax(x, dim=1))
    ref_c = jnp.argmax(x, axis=1)
    assert out_c.shape == (2, 16, 16)
    assert bool(jnp.all(out_c == ref_c))

    # ArgMax(dim=-1): trailing axis.
    out_w = jax.block_until_ready(pallas_argmax(x, dim=-1))
    ref_w = jnp.argmax(x, axis=-1)
    assert out_w.shape == (2, 4, 16)
    assert bool(jnp.all(out_w == ref_w))

    # Sub-32-bit input stays in its native dtype in HBM (no wrapper f32 cast).
    xb = x.astype(jnp.bfloat16)
    out_b = jax.block_until_ready(pallas_argmax(xb, dim=-1))
    assert bool(jnp.all(out_b == jnp.argmax(xb, axis=-1)))

    print("KERNEL_OK")
</pallas_src>

<mosaic_0001>
module attributes {stable_mosaic.version = 11 : i64} {
  func.func @_rows_single_kernel(%arg0: i32, %arg1: memref<8x128xf32, #tpu.memory_space<vmem>>, %arg2: memref<8x1xi32, #tpu.memory_space<vmem>>, %arg3: memref<8x1xf32, #tpu.memory_space<vmem>>) attributes {dimension_semantics = [#tpu.dimension_semantics<parallel>], iteration_bounds = array<i64: 2>, scalar_prefetch = 0 : i64, scratch_operands = 0 : i64, tpu.core_type = #tpu.core_type<tc>, window_params = [{transform_indices = @transform_0, window_bounds = array<i64: 8, 128>}, {transform_indices = @transform_1, window_bounds = array<i64: 8, 1>}, {transform_indices = @transform_2, window_bounds = array<i64: 8, 1>}]} {
    %c0 = arith.constant 0 : index
    %c0_0 = arith.constant 0 : index
    %0 = vector.load %arg1[%c0, %c0_0] : memref<8x128xf32, #tpu.memory_space<vmem>>, vector<8x128xf32>
    %cst = arith.constant dense<0xFF800000> : vector<8xf32>
    %1 = vector.multi_reduction <maximumf>, %0, %cst [1] : vector<8x128xf32> to vector<8xf32>
    %2 = vector.shape_cast %1 : vector<8xf32> to vector<8x1xf32>
    %3 = tpu.iota {dimensions = array<i32: 1>} : vector<8x128xi32>
    %4 = vector.broadcast %2 : vector<8x1xf32> to vector<8x128xf32>
    %5 = arith.cmpf oeq, %0, %4 : vector<8x128xf32>
    %c128_i32 = arith.constant 128 : i32
    %6 = vector.broadcast %c128_i32 : i32 to vector<8x128xi32>
    %7 = arith.select %5, %3, %6 : vector<8x128xi1>, vector<8x128xi32>
    %cst_1 = arith.constant dense<2147483647> : vector<8xi32>
    %8 = vector.multi_reduction <minsi>, %7, %cst_1 [1] : vector<8x128xi32> to vector<8xi32>
    %9 = vector.shape_cast %8 : vector<8xi32> to vector<8x1xi32>
    %c0_2 = arith.constant 0 : index
    %c0_3 = arith.constant 0 : index
    %10 = vector.load %arg2[%c0_2, %c0_3] : memref<8x1xi32, #tpu.memory_space<vmem>>, vector<8x1xi32>
    tpu.vector_store %arg2[%c0_2, %c0_3], %9 {strides = array<i32>} : memref<8x1xi32, #tpu.memory_space<vmem>>, vector<8x1xi32>,
    %c0_4 = arith.constant 0 : index
    %c0_5 = arith.constant 0 : index
    %11 = vector.load %arg3[%c0_4, %c0_5] : memref<8x1xf32, #tpu.memory_space<vmem>>, vector<8x1xf32>
    tpu.vector_store %arg3[%c0_4, %c0_5], %2 {strides = array<i32>} : memref<8x1xf32, #tpu.memory_space<vmem>>, vector<8x1xf32>,
    return
  }
  func.func @transform_0(%arg0: i32) -> (i32, i32) {
    %c0_i32 = arith.constant 0 : i32
    %c0_i32_0 = arith.constant 0 : i32
    return %arg0, %c0_i32 : i32, i32
  }
  func.func @transform_1(%arg0: i32) -> (i32, i32) {
    %c0_i32 = arith.constant 0 : i32
    %c0_i32_0 = arith.constant 0 : i32
    return %arg0, %c0_i32 : i32, i32
  }
  func.func @transform_2(%arg0: i32) -> (i32, i32) {
    %c0_i32 = arith.constant 0 : i32
    %c0_i32_0 = arith.constant 0 : i32
    return %arg0, %c0_i32 : i32, i32
  }
}

</mosaic_0001>

<bundles_post_ra>
// kernel: tpu_custom_call.1
= control target key start
LH: loop header
LB: loop body
LE: loop exit
PB: predicated region body
PF: predicated region fallthrough
CT: control target
= control target key end

     0   :  { %8 = vsyncpa [#allocation3], 0  ;;  %s534_s0 = inlined_call_operand.hbm [shape: f32[16,128], index: 0, kind: input, shape index: {}]   ;;  %s535_s1 = inlined_call_operand.vmem [shape: s32[16,1], index: 1, kind: output, shape index: {0}]   ;;  %s536_s2 = inlined_call_operand.vmem [shape: f32[16,1], index: 2, kind: output, shape index: {1}]  }
   0x1   :  { %10 = vsyncpa [#allocation3 + $0x1], 0  ;;  %s422_s9 = smov 0   ;;  %s424_s10 = smov 0  }
   0x2   :  { %s426_s11 = smov 0   ;;  %s428_s12 = smov 0  }
   0x3 LB: > { %s441_s13 = sadd.s32 4294967295, %s404_s12   ;;  %s444_s14 = sadd.s32 1, %s404_s12   ;;  %s404_s12 = sphi %s428_s12, %s544_s12   ;;  %s400_s11 = sphi %s426_s11, %s543_s11   ;;  %s396_s10 = sphi %s424_s10, %s542_s10   ;;  %s392_s9 = sphi %s422_s9, %s541_s9  }
   0x4   : > { %s20_s15 = ssub.s32 %s404_s12, %s444_s14  ;;  %s23_s16 = sadd.s32 1, %s400_s11 }
   0x5   : > { %p21_p0 = scmp.eq.s32.totalorder %s20_s15, 0  ;;  %p30_p1 = scmp.ne.s32.totalorder %s400_s11, %s396_s10 }
   0x6   : > { %p31_p2 = scmp.eq.s32.totalorder %s404_s12, 0  ;;  %p36_p3 = scmp.ne.s32.totalorder %s396_s10, %s392_s9 }
   0x7   : > { %s454_s17 = scalar_select %p21_p0, %s400_s11, %s23_s16  }
   0x8   : > { %p32_p4 = por %p31_p2, %p30_p1  ;;  %p37_p5 = scmp.eq.s32.totalorder %s441_s13, 0 }
   0x9   : > { %p307_p6 = scmp.lt.s32.totalorder %s404_s12, 2  ;;  %s112_s19 = sand.u32 1, %s400_s11  }
   0xa   : > { %p458_p7 = por %p37_p5, %p36_p3  ;;  %s293_s20 = sshll.u32 %s112_s19, 3 }
   0xb   : > { %s294_s21 = sshll.u32 %s404_s12, 7  ;;  %s116_s25 = scalar_lea.vmem [#allocation2], %s293_s20 }
   0xc   : > { %s467_s24 = scalar_lea.hbm %s534_s0, %s294_s21  ;;  %s123_s26 = sshll.u32 %s116_s25, 4  ;;  %s469_s26 = int_to_ptr.vmem [resolvable:$true] %s123_s26 }
   0xd   : > { %p471_p8 = pnand %p307_p6, %p32_p4  ;;  %s113_s28 = scalar_lea.sflag [#allocation3], %s112_s19 }
   0xe   : > { %s340_s29 = scalar_lea.hbm %s467_s24, 128  ;;  %s345_s4 = scalar_lea.hbm %s534_s0, 256 }
   0xf   : > { %p341_p11 = scmp.ne.s32.totalorder %s467_s24, %s340_s29  ;;  %p342_p12 = pneg %p471_p8 }
  0x10   : > { %p346_p1 = scmp.lt.u32.totalorder %s467_s24, %s534_s0  ;;  %p347_p2 = scmp.lt.u32.totalorder %s345_s4, %s340_s29 }
  0x11   : > { %p343_p13 = pnand %p342_p12, %p341_p11  ;;  %p349_p4 = scmp.lt.u32.totalorder %s340_s29, %s467_s24 }
  0x12   : > { %p348_p3 = por %p347_p2, %p346_p1 }
  0x13   : > { %p344_p0 = pneg %p343_p13 }
  0x14   : > { %p350_p5 = por %p349_p4, %p348_p3 }
  0x16   : > { %p351_p6 = pnand %p350_p5, %p344_p0 }
  0x18   : > { %354 = shalt.err (!%p351_p6)
}
  0x19   : > { %s355_s7 = scalar_lea.vmem %s469_s26, 128  ;;  %s406_s8 = smov [#allocation2]  }
  0x1a   : > { %p356_p11 = scmp.ne.s32.totalorder %s469_s26, %s355_s7  ;;  %s360_s9 = sshll.u32 %s406_s8, 4  ;;  %s361_s9 = int_to_ptr.vmem [resolvable:$false] %s360_s9 }
  0x1b   : > { %s362_s15 = scalar_lea.vmem %s361_s9, 256  ;;  %p363_p10 = scmp.lt.s32.totalorder %s469_s26, %s361_s9 }
  0x1c   : > { %p358_p13 = pnand %p356_p11, %p342_p12  ;;  %p364_p1 = scmp.lt.s32.totalorder %s362_s15, %s355_s7 }
  0x1e   : > { %p359_p9 = pneg %p358_p13  ;;  %p365_p2 = por %p364_p1, %p363_p10 }
  0x20   : > { %p366_p3 = pnand %p365_p2, %p359_p9 }
  0x22   : > { %369 = shalt.err (!%p366_p3)
}
  0x23   : > { %306 = dma.hbm_to_vmem [thread:$0]  (!%p471_p8), %s467_s24, 128, %s469_s26, %s113_s28  }
  0x24   : > { %p539_p0 = scmp.lt.s32.totalorder %s404_s12, 3  ;;  %p540_p4 = scmp.ge.s32.totalorder %s404_s12, 1 }
  0x26   : > { %p129_p12 = pnand %p540_p4, %p539_p0 }
  0x27   : > { %s134_s16 = sand.u32 (!%p129_p12), 1, %s396_s10  }
  0x28   : > { %132 = sbr.rel (%p129_p12) target bundleno = 488 (0x1e8), region = 24  ;;  %s296_s19 = sshll.u32 (!%p129_p12), %s134_s16, 3 }
  0x29   : > { %s135_s20 = scalar_lea.sflag (!%p129_p12), [#allocation3], %s134_s16  ;;  %s138_s21 = scalar_lea.vmem (!%p129_p12), [#allocation2], %s296_s19 }
  0x2f   : > { %387 = dma.done.wait (%p458_p7), %s135_s20, 128  }
  0x30   : > { %389 = vsyncadd (%p458_p7), %s135_s20, 4294967168  ;;  %v170_v0 = vld [vmem:[%s138_s21] sm:$0xff]  ;;  %p162_p8 = scmp.lt.s32.totalorder %s441_s13, 1  ;;  %v173_v1 = vlaneseq  ;;  %vm191_vm0 = vcmask 7168  }
  0x31   : > { %171 = vmax.xlane.f32.xlu0 %v170_v0 }
  0x32   : > { %s546_s13 = smov (!%p162_p8, %s441_s13), 1  ;;  %v174_v2 = vand.u32 127, %v173_v1 }
  0x33   : > { %s297_s12 = sshll.u32 %s546_s13, 3 }
  0x34   : > { %s169_s24 = scalar_lea.vmem %s536_s2, %s297_s12  ;;  %s165_s25 = scalar_lea.vmem %s535_s1, %s297_s12 }
  0xbe   : > { %v172_v3 = vpop.xlane.xlu0 %171 }
  0xbf   : > { %vm175_vm1 = vcmp.eq.f32.partialorder %v170_v0, %v172_v3  ;;  %193 = vst.msk [vmem:[%s169_s24] sm:$0xff] %vm191_vm0, %v172_v3 }
  0xc0   : > { %v176_v4 = vsel %vm175_vm1, %v174_v2, 128 }
  0xc1   : > { %v178_v5 = vshra.s32 %v176_v4, 16  ;;  %v177_v7 = vand.u32 65535, %v176_v4 }
  0xc3   : > { %v180_v6 = vcvt.s32.f32 %v178_v5  ;;  %v179_v9 = vcvt.s32.f32 %v177_v7 }
  0xc5   : > { %181 = vmin.xlane.f32.xlu0 %v180_v6 }
 0x152   : > { %v182_v8 = vpop.xlane.xlu0 %181 }
 0x153   : > { %vm183_vm2 = vcmp.eq.f32.partialorder %v180_v6, %v182_v8  ;;  %v188_v11 = vcvt.f32.s32 %v182_v8 }
 0x154   : > { %v184_v10 = vsel %vm183_vm2, %v179_v9, inf }
 0x155   : > { %185 = vmin.xlane.f32.xlu1 %v184_v10  ;;  %v189_v13 = vshll.u32 %v188_v11, 16 }
 0x1e2   : > { %v186_v12 = vpop.xlane.xlu1 %185 }
 0x1e3   : > { %v187_v14 = vcvt.f32.s32 %v186_v12 }
 0x1e5   : > { %v190_v15 = vadd.s32 %v189_v13, %v187_v14 }
 0x1e7   : > { %192 = vst.msk [vmem:[%s165_s25] sm:$0xff] %vm191_vm0, %v190_v15 }
 0x1e8 PF: > { %p13_p7 = scmp.ge.s32.totalorder %s444_s14, 4   ;;  %s541_s9 = smov %s396_s10 }
 0x1e9   : > { %s542_s10 = smov %s400_s11  ;;  %s543_s11 = smov %s454_s17 }
 0x1ea   : > { %s544_s12 = smov %s444_s14  ;;  %15 = sbr.rel (!%p13_p7) target bundleno = 3 (0x3), region = 76 }
 0x1f1   :  { %227 = vsyncpa [#allocation3], 1 }
 0x1f2   :  { %229 = vsyncpa [#allocation3 + $0x1], 1 }

</bundles_post_ra>
